<compile_context>
chip_gen: v6e
topology: v6e:2x2x1
jax: 0.10.0
libtpu: 0.0.40
codegen_flags: <defaults>
</compile_context>

<pallas_src>
import functools

import jax
import jax.numpy as jnp
from jax import lax
from jax.experimental import pallas as pl
from jax.experimental.pallas import tpu as pltpu


def _round_up(x, n):
    return ((x + n - 1) // n) * n


def _linear_kernel(x_ref, w_ref, b_ref, o_ref, *, compute_dtype):
    # x_ref: (TM, P*K) f32   w_ref: (P*K, P*D) compute_dtype (bf16)
    # b_ref: (1, P*D)  f32   o_ref: (TM, P*D)  out dtype
    x = x_ref[...].astype(compute_dtype)
    acc = jnp.dot(
        x,
        w_ref[...],
        preferred_element_type=jnp.float32,
        precision=lax.Precision.DEFAULT,  # explicit: single MXU pass on bf16 operands
    )
    o_ref[...] = (acc + b_ref[...]).astype(o_ref.dtype)


def spatial_embedding(
    eigenmaps,
    weight,
    bias,
    *,
    compute_dtype=jnp.bfloat16,
    out_dtype=None,
    max_tm=2048,
    target_steps=8,
    min_pallas_rows=256,
    vmem_limit_bytes=32 * 1024 * 1024,
):
    """Forward of nn.Linear(eigenmaps_k, d_model).

    eigenmaps: (..., K); weight: (D, K) [torch nn.Linear layout]; bias: (D,).
    """
    *lead, k = eigenmaps.shape
    d = weight.shape[0]
    out_dtype = eigenmaps.dtype if out_dtype is None else out_dtype

    x = eigenmaps.reshape(-1, k)
    m = x.shape[0]
    wt = weight.T  # (K, D)

    # Packing factor: pad K up to the nearest divisor of 128 so that
    # P = 128 // K_pad logical rows fold into one 128-lane packed row.
    k_pad = k
    if k <= 128:
        while 128 % k_pad != 0:
            k_pad += 1
    p = 128 // k_pad if k_pad <= 128 else 1

    m_rows = -(-m // p)  # packed row count (ceil)

    # Tiny-problem fallback: pallas launch + kron/pad preprocessing dominate.
    if m_rows < min_pallas_rows:
        out = (
            jnp.dot(
                x.astype(compute_dtype),
                wt.astype(compute_dtype),
                preferred_element_type=jnp.float32,
                precision=lax.Precision.DEFAULT,
            )
            + bias.astype(jnp.float32)
        )
        return out.astype(out_dtype).reshape(*lead, d)

    if k_pad != k:
        x = jnp.pad(x, ((0, 0), (0, k_pad - k)))
        wt = jnp.pad(wt, ((0, k_pad - k), (0, 0)))

    if m_rows * p != m:
        # TODO(synk): handle the <P-row tail with a tiny matmul outside the
        # kernel to avoid this full-input pad copy (minor: input stream is the
        # small one, ~8% of total HBM traffic).
        x = jnp.pad(x, ((0, m_rows * p - m), (0, 0)))
    xp = x.reshape(m_rows, p * k_pad)  # row-major repack (free reshape)

    # Block-diagonal weight in bf16 (compute dtype); bias tiled, kept f32.
    w_blk = jnp.kron(jnp.eye(p, dtype=compute_dtype), wt.astype(compute_dtype))
    b_blk = jnp.tile(bias.astype(jnp.float32), p).reshape(1, p * d)

    pk, pd = p * k_pad, p * d

    # --- M tile selection -------------------------------------------------
    # Enough grid steps to pipeline (and feed both v7x cores), bounded by
    # max_tm and a ~20 MiB double-buffered block budget (safe on all gens
    # with the explicit 32 MiB scoped-VMEM limit below).
    in_bytes = xp.dtype.itemsize
    out_bytes = jnp.dtype(out_dtype).itemsize
    w_bytes = pk * pd * jnp.dtype(compute_dtype).itemsize + pd * 4
    row_bytes = pk * in_bytes + pd * out_bytes
    block_budget = 20 * 1024 * 1024
    tm_budget = max(8, (block_budget - 2 * w_bytes) // (2 * row_bytes))
    tm = min(max_tm, int(tm_budget), -(-m_rows // target_steps))
    if m_rows >= 8:
        tm = max(8, _round_up(tm, 8))
    else:
        tm = m_rows  # full-dim block (legal); degenerate tiny case
    grid = (pl.cdiv(m_rows, tm),)

    flops = 2 * m_rows * pk * pd
    bytes_accessed = (
        m_rows * pk * in_bytes
        + pk * pd * jnp.dtype(compute_dtype).itemsize
        + pd * 4
        + m_rows * pd * out_bytes
    )
    cost = pl.CostEstimate(
        flops=flops, transcendentals=0, bytes_accessed=bytes_accessed
    )

    kernel = functools.partial(_linear_kernel, compute_dtype=compute_dtype)

    out = pl.pallas_call(
        kernel,
        out_shape=jax.ShapeDtypeStruct((m_rows, pd), out_dtype),
        grid_spec=pltpu.PrefetchScalarGridSpec(
            num_scalar_prefetch=0,
            grid=grid,
            in_specs=[
                pl.BlockSpec((tm, pk), lambda i: (i, 0)),
                pl.BlockSpec((pk, pd), lambda i: (0, 0)),  # weight stays resident
                pl.BlockSpec((1, pd), lambda i: (0, 0)),   # bias stays resident
            ],
            out_specs=pl.BlockSpec((tm, pd), lambda i: (i, 0)),
        ),
        compiler_params=pltpu.CompilerParams(
            dimension_semantics=("parallel",),
            vmem_limit_bytes=vmem_limit_bytes,
        ),
        cost_estimate=cost,
    )(xp, w_blk, b_blk)

    out = out.reshape(m_rows * p, d)  # unpack rows (free reshape)
    if m_rows * p != m:
        out = out[:m]
    return out.reshape(*lead, d)


if __name__ == "__main__":
    eigenmaps_k = 8
    d_model = 32

    key = jax.random.PRNGKey(0)
    k_x, k_w, k_b, k_x2, k_x3, k_w3, k_b3 = jax.random.split(key, 7)

    bound = 1.0 / (eigenmaps_k ** 0.5)
    weight = jax.random.uniform(
        k_w, (d_model, eigenmaps_k), minval=-bound, maxval=bound, dtype=jnp.float32
    )
    bias = jax.random.uniform(
        k_b, (d_model,), minval=-bound, maxval=bound, dtype=jnp.float32
    )

    # 1) Tiny demo shape (batch=2, nodes=16, k=8): takes the fused-XLA small-M path.
    x_small = jax.random.normal(k_x, (2, 16, eigenmaps_k), dtype=jnp.float32)
    out_small = jax.block_until_ready(spatial_embedding(x_small, weight, bias))
    ref_small = x_small @ weight.T + bias
    assert out_small.shape == (2, 16, d_model)
    assert jnp.allclose(out_small, ref_small, atol=2e-2, rtol=2e-2)

    # 2) Pallas path (forced): batch=2, nodes=300 -> 600 rows, 38 packed rows.
    #    Exercises the tail pad (600 % 16 != 0), ragged last block, multi-step grid.
    x_med = jax.random.normal(k_x2, (2, 300, eigenmaps_k), dtype=jnp.float32)
    out_med = jax.block_until_ready(
        spatial_embedding(x_med, weight, bias, min_pallas_rows=0)
    )
    ref_med = x_med @ weight.T + bias
    assert out_med.shape == (2, 300, d_model)
    assert jnp.allclose(out_med, ref_med, atol=2e-2, rtol=2e-2)

    # 3) Pallas path with K=12 (128 % K != 0): K padded to 16, P=8.
    k3 = 12
    b3 = 1.0 / (k3 ** 0.5)
    w3 = jax.random.uniform(k_w3, (d_model, k3), minval=-b3, maxval=b3, dtype=jnp.float32)
    bi3 = jax.random.uniform(k_b3, (d_model,), minval=-b3, maxval=b3, dtype=jnp.float32)
    x3 = jax.random.normal(k_x3, (2, 200, k3), dtype=jnp.float32)
    out3 = jax.block_until_ready(spatial_embedding(x3, w3, bi3, min_pallas_rows=0))
    ref3 = x3 @ w3.T + bi3
    assert out3.shape == (2, 200, d_model)
    assert jnp.allclose(out3, ref3, atol=2e-2, rtol=2e-2)

    print("KERNEL_OK")
</pallas_src>

<mosaic_0001>
module attributes {stable_mosaic.version = 11 : i64} {
  func.func @_linear_kernel(%arg0: i32, %arg1: memref<8x128xf32, #tpu.memory_space<vmem>>, %arg2: memref<128x512xbf16, #tpu.memory_space<vmem>>, %arg3: memref<1x512xf32, #tpu.memory_space<vmem>>, %arg4: memref<8x512xf32, #tpu.memory_space<vmem>>) attributes {dimension_semantics = [#tpu.dimension_semantics<parallel>], iteration_bounds = array<i64: 5>, scalar_prefetch = 0 : i64, scratch_operands = 0 : i64, tpu.core_type = #tpu.core_type<tc>, window_params = [{transform_indices = @transform_0, window_bounds = array<i64: 8, 128>}, {pipeline_mode = #tpu.pipeline_mode<synchronous>, transform_indices = @transform_1, window_bounds = array<i64: 128, 512>}, {pipeline_mode = #tpu.pipeline_mode<synchronous>, transform_indices = @transform_2, window_bounds = array<i64: 1, 512>}, {transform_indices = @transform_3, window_bounds = array<i64: 8, 512>}]} {
    %c0 = arith.constant 0 : index
    %c0_0 = arith.constant 0 : index
    %0 = vector.load %arg1[%c0, %c0_0] : memref<8x128xf32, #tpu.memory_space<vmem>>, vector<8x128xf32>
    %1 = arith.truncf %0 : vector<8x128xf32> to vector<8x128xbf16>
    %c0_1 = arith.constant 0 : index
    %c0_2 = arith.constant 0 : index
    %2 = vector.load %arg2[%c0_1, %c0_2] : memref<128x512xbf16, #tpu.memory_space<vmem>>, vector<128x512xbf16>
    %cst = arith.constant dense<0.000000e+00> : vector<8x512xf32>
    %3 = tpu.matmul %1, %2, %cst {dimension_numbers = #tpu.dot_dimension_numbers<[1], [0], [0], [1], [0, 0, 1, 1], [], []>} : vector<8x128xbf16>, vector<128x512xbf16>, vector<8x512xf32> -> vector<8x512xf32>
    %c0_3 = arith.constant 0 : index
    %c0_4 = arith.constant 0 : index
    %4 = vector.load %arg3[%c0_3, %c0_4] : memref<1x512xf32, #tpu.memory_space<vmem>>, vector<1x512xf32>
    %5 = vector.broadcast %4 : vector<1x512xf32> to vector<8x512xf32>
    %6 = arith.addf %3, %5 : vector<8x512xf32>
    %c0_5 = arith.constant 0 : index
    %c0_6 = arith.constant 0 : index
    %7 = vector.load %arg4[%c0_5, %c0_6] : memref<8x512xf32, #tpu.memory_space<vmem>>, vector<8x512xf32>
    tpu.vector_store %arg4[%c0_5, %c0_6], %6 {strides = array<i32>} : memref<8x512xf32, #tpu.memory_space<vmem>>, vector<8x512xf32>,
    return
  }
  func.func @transform_0(%arg0: i32) -> (i32, i32) {
    %c0_i32 = arith.constant 0 : i32
    %c0_i32_0 = arith.constant 0 : i32
    return %arg0, %c0_i32 : i32, i32
  }
  func.func @transform_1(%arg0: i32) -> (i32, i32) {
    %c0_i32 = arith.constant 0 : i32
    %c0_i32_0 = arith.constant 0 : i32
    %c0_i32_1 = arith.constant 0 : i32
    return %c0_i32, %c0_i32_0 : i32, i32
  }
  func.func @transform_2(%arg0: i32) -> (i32, i32) {
    %c0_i32 = arith.constant 0 : i32
    %c0_i32_0 = arith.constant 0 : i32
    %c0_i32_1 = arith.constant 0 : i32
    return %c0_i32, %c0_i32_0 : i32, i32
  }
  func.func @transform_3(%arg0: i32) -> (i32, i32) {
    %c0_i32 = arith.constant 0 : i32
    %c0_i32_0 = arith.constant 0 : i32
    return %arg0, %c0_i32 : i32, i32
  }
}

</mosaic_0001>

<bundles_post_ra>
// kernel: tpu_custom_call.1
= control target key start
LH: loop header
LB: loop body
LE: loop exit
PB: predicated region body
PF: predicated region fallthrough
CT: control target
= control target key end

     0   :  { %8 = vsyncpa [#allocation3], 0  ;;  %s1144_s0 = inlined_call_operand.hbm [shape: f32[38,128], index: 0, kind: input, shape index: {}]   ;;  %s1145_s1 = inlined_call_operand.hbm [shape: bf16[128,512], index: 1, kind: input, shape index: {}]   ;;  %s1146_s2 = inlined_call_operand.hbm [shape: f32[1,512], index: 2, kind: input, shape index: {}]   ;;  %s1147_s3 = inlined_call_operand.hbm [shape: f32[38,512], index: 3, kind: output, shape index: {}]  }
   0x1   :  { %10 = vsyncpa [#allocation3 + $0x1], 0 }
   0x2   :  { %11 = vsyncpa [#allocation6], 0 }
   0x3   :  { %12 = vsyncpa [#allocation4], 0 }
   0x4   :  { %14 = vsyncpa [#allocation4 + $0x1], 0  ;;  %s965_s12 = smov 0   ;;  %s967_s13 = smov 0  }
   0x5   :  { %s969_s14 = smov 0   ;;  %s971_s15 = smov 0  }
   0x6 LB: > { %s986_s16 = sadd.s32 4294967295, %s936_s15   ;;  %s620_s17 = sadd.s32 4294967294, %s936_s15   ;;  %s936_s15 = sphi %s971_s15, %s1168_s15   ;;  %s932_s14 = sphi %s969_s14, %s1167_s14   ;;  %s928_s13 = sphi %s967_s13, %s1166_s13   ;;  %s924_s12 = sphi %s965_s12, %s1165_s12  }
   0x7   : > { %p40_p0 = scmp.ne.s32.totalorder %s928_s13, %s924_s12  ;;  %p1148_p1 = scmp.eq.s32.totalorder %s986_s16, 0 }
   0x8   : > { %p112_p3 = scmp.eq.s32.totalorder %s620_s17, 4  ;;  %p621_p5 = scmp.ge.s32.totalorder %s936_s15, 1 }
   0x9   : > { %p995_p4 = por %p1148_p1, %p40_p0  ;;  %p119_p7 = scmp.lt.s32.totalorder %s936_s15, 6 }
   0xa   : > { %p1000_p6 = por %p112_p3, %p40_p0  ;;  %s938_s21 = smov [#allocation5]  }
   0xb   : > { %s1152_s18 = scalar_select %p995_p4, 1, 0 }
   0xc   : > { %s1153_s19 = scalar_select %p1000_p6, 1, 0 }
   0xd   : > { %p1005_p8 = pnand %p621_p5, %p119_p7  ;;  %s131_s22 = sshll.u32 %s938_s21, 4  ;;  %s132_s22 = int_to_ptr.vmem [resolvable:$true] %s131_s22 }
   0xe   : > { %s939_s24 = smov [#allocation7]   ;;  %s799_s26 = scalar_lea.vmem %s132_s22, 4096 }
   0xf   : > { %s1154_s20 = scalar_select %p1005_p8, 1, 0 }
  0x10   : > { %p682_p9 = pneg %p1005_p8  ;;  %s145_s25 = sshll.u32 %s939_s24, 4  ;;  %s146_s25 = int_to_ptr.vmem [resolvable:$true] %s145_s25 }
  0x11   : > { %p800_p12 = scmp.ne.s32.totalorder %s132_s22, %s799_s26  ;;  %p807_p3 = scmp.lt.s32.totalorder %s132_s22, %s132_s22 }
  0x12   : > { %p1013_p10 = pnand %p682_p9, %p1148_p1  ;;  %p808_p5 = scmp.lt.s32.totalorder %s799_s26, %s799_s26 }
  0x14   : > { %p790_p11 = pneg %p1013_p10  ;;  %p809_p7 = por %p808_p5, %p807_p3 }
  0x16   : > { %p802_p13 = pnand %p800_p12, %p790_p11 }
  0x18   : > { %p803_p0 = pneg %p802_p13 }
  0x1a   : > { %p810_p9 = pnand %p809_p7, %p803_p0 }
  0x1c   : > { %813 = shalt.err (!%p810_p9)
}
  0x1d   : > { %s940_s27 = smov 256   ;;  %s941_s28 = smov 16  }
  0x1e   : > { %685 = dma.hbm_to_vmem [thread:$0]  (!%p1013_p10), %s1145_s1, 4096, %s132_s22, [#allocation6], %s940_s27, %s940_s27, %s941_s28  }
  0x1f   : > { %s825_s4 = scalar_lea.vmem %s146_s25, 64  ;;  %p833_p2 = scmp.lt.s32.totalorder %s146_s25, %s146_s25 }
  0x20   : > { %p826_p1 = scmp.ne.s32.totalorder %s146_s25, %s825_s4  ;;  %p834_p6 = scmp.lt.s32.totalorder %s825_s4, %s825_s4 }
  0x22   : > { %p828_p12 = pnand %p826_p1, %p790_p11  ;;  %p835_p3 = por %p834_p6, %p833_p2 }
  0x24   : > { %p829_p13 = pneg %p828_p12 }
  0x26   : > { %p836_p0 = pnand %p835_p3, %p829_p13 }
  0x28   : > { %839 = shalt.err (!%p836_p0)
}
  0x29   : > { %688 = dma.hbm_to_vmem [thread:$0]  (!%p1013_p10), %s1146_s2, 64, %s146_s25, [#allocation6]  }
  0x2a   : > { %s1036_s7 = sadd.s32 1, %s936_s15   ;;  %s27_s8 = sadd.s32 1, %s932_s14 }
  0x2b   : > { %s24_s9 = ssub.s32 %s936_s15, %s1036_s7  ;;  %p34_p1 = scmp.ne.s32.totalorder %s932_s14, %s928_s13 }
  0x2c   : > { %p25_p2 = scmp.eq.s32.totalorder %s24_s9, 0  ;;  %p35_p6 = scmp.eq.s32.totalorder %s936_s15, 0 }
  0x2d   : > { %p1156_p11 = scmp.eq.s32.totalorder %s986_s16, 4  ;;  %p699_p7 = scmp.lt.s32.totalorder %s936_s15, 5 }
  0x2e   : > { %s1052_s11 = scalar_select %p25_p2, %s932_s14, %s27_s8  }
  0x2f   : > { %p1046_p5 = por %p1156_p11, %p34_p1  ;;  %p36_p9 = por %p35_p6, %p34_p1 }
  0x30   : > { %s156_s17 = sand.u32 1, %s932_s14   ;;  %s626_s22 = sshll.u32 %s936_s15, 7 }
  0x31   : > { %s1157_s10 = scalar_select %p1046_p5, 1, 0 }
  0x32   : > { %s625_s21 = sshll.u32 %s156_s17, 3  ;;  %s1059_s25 = scalar_lea.hbm %s1144_s0, %s626_s22 }
  0x33   : > { %s160_s26 = scalar_lea.vmem [#allocation2], %s625_s21  ;;  %p1061_p10 = pnand %p699_p7, %p36_p9 }
  0x34   : > { %s167_s27 = sshll.u32 %s160_s26, 4  ;;  %s157_s29 = scalar_lea.sflag [#allocation3], %s156_s17  ;;  %s168_s27 = int_to_ptr.vmem [resolvable:$true] %s167_s27 }
  0x35   : > { %s840_s30 = scalar_lea.hbm %s1059_s25, 128  ;;  %p842_p13 = pneg %p1061_p10 }
  0x36   : > { %p841_p12 = scmp.ne.s32.totalorder %s1059_s25, %s840_s30  ;;  %s845_s6 = scalar_lea.hbm %s1144_s0, 640 }
  0x37   : > { %p846_p1 = scmp.lt.s32.totalorder %s1059_s25, %s1144_s0  ;;  %p847_p2 = scmp.lt.s32.totalorder %s845_s6, %s840_s30 }
  0x38   : > { %p843_p3 = pnand %p842_p13, %p841_p12 }
  0x39   : > { %p848_p6 = por %p847_p2, %p846_p1 }
  0x3a   : > { %p844_p0 = pneg %p843_p3 }
  0x3c   : > { %p849_p11 = pnand %p848_p6, %p844_p0 }
  0x3e   : > { %852 = shalt.err (!%p849_p11)
}
  0x3f   : > { %s853_s21 = scalar_lea.vmem %s168_s27, 128  ;;  %s942_s17 = smov [#allocation2]  }
  0x40   : > { %p854_p7 = scmp.ne.s32.totalorder %s168_s27, %s853_s21  ;;  %s858_s22 = sshll.u32 %s942_s17, 4  ;;  %s859_s22 = int_to_ptr.vmem [resolvable:$false] %s858_s22 }
  0x41   : > { %s860_s23 = scalar_lea.vmem %s859_s22, 256  ;;  %p861_p12 = scmp.lt.s32.totalorder %s168_s27, %s859_s22 }
  0x42   : > { %p856_p9 = pnand %p854_p7, %p842_p13  ;;  %p862_p3 = scmp.lt.s32.totalorder %s860_s23, %s853_s21 }
  0x44   : > { %p857_p5 = pneg %p856_p9  ;;  %p863_p4 = por %p862_p3, %p861_p12 }
  0x46   : > { %p864_p8 = pnand %p863_p4, %p857_p5 }
  0x48   : > { %867 = shalt.err (!%p864_p8)
}
  0x49   : > { %692 = dma.hbm_to_vmem [thread:$0]  (!%p1061_p10), %s1059_s25, 128, %s168_s27, %s157_s29  }
  0x4a   : > { %p1159_p0 = scmp.ne.s32.totalorder %s1154_s20, 0 }
  0x4b   : > { %s1082_s24 = sand.u32 (!%p1159_p0), 1, %s928_s13   ;;  %p1160_p13 = scmp.ne.s32.totalorder (!%p1159_p0), %s1152_s18, 0 }
  0x4c   : > { %176 = sbr.rel (%p1159_p0) target bundleno = 330 (0x14a), region = 32  ;;  %s628_s26 = sshll.u32 (!%p1159_p0), %s1082_s24, 3 }
  0x4d   : > { %s179_s30 = scalar_lea.sflag (!%p1159_p0), [#allocation3], %s1082_s24  ;;  %s1086_s4 = scalar_lea.vmem (!%p1159_p0), [#allocation2], %s628_s26 }
  0x51   : > { %911 = dma.done.wait (%p1160_p13), %s179_s30, 128  }
  0x52   : > { %913 = vsyncadd (%p1160_p13), %s179_s30, 4294967168  ;;  %p1161_p4 = scmp.eq.s32.totalorder %s986_s16, 0 }
  0x54   : > { %915 = dma.done.wait (%p1161_p4), [#allocation6], 4160   ;;  %p1162_p8 = pmov %p1161_p4 }
  0x55   : > { %v943_v0 = vmov 0   ;;  %v740_v1 = vld [vmem:[#allocation5 + $0xe4] ss:$16 sps:$4 sm:$0xff]   ;;  %v742_v2 = vld [vmem:[#allocation5 + $0xec] ss:$16 sps:$4 sm:$0xff]   ;;  %v250_v35 = vlaneseq  ;;  %s631_s18 = sshll.u32 %s1082_s24, 5 }
  0x56   : > { %917 = vsyncadd (%p1162_p8), [#allocation6], 4294963136  ;;  %462 = vmatprep.mubr.bf16.mxu0 %v943_v0  ;;  %503 = vmatprep.mubr.bf16.mxu1 %v943_v0  ;;  %v744_v3 = vld [vmem:[#allocation5 + $0xe0] ss:$16 sps:$4 sm:$0xff]   ;;  %v745_v4 = vld [vmem:[#allocation5 + $0xe8] ss:$16 sps:$4 sm:$0xff]  }
  0x57   : > { %430 = vmatprep.subr.bf16.mxu0 %v740_v1  ;;  %471 = vmatprep.subr.bf16.mxu1 %v742_v2  ;;  %v746_v5 = vld [vmem:[#allocation5 + $0xc4] ss:$16 sps:$4 sm:$0xff]   ;;  %v748_v6 = vld [vmem:[#allocation5 + $0xcc] ss:$16 sps:$4 sm:$0xff]   ;;  %v750_v7 = vld [vmem:[#allocation5 + $0xc0] ss:$16 sps:$4 sm:$0xff]  }
  0x58   : > { %431 = vmatpush1.bf16.msra.mxu0 %v744_v3  ;;  %472 = vmatpush1.bf16.msra.mxu1 %v745_v4  ;;  %v751_v8 = vld [vmem:[#allocation5 + $0xc8] ss:$16 sps:$4 sm:$0xff]   ;;  %v752_v9 = vld [vmem:[#allocation5 + $0xa4] ss:$16 sps:$4 sm:$0xff]   ;;  %v754_v10 = vld [vmem:[#allocation5 + $0xac] ss:$16 sps:$4 sm:$0xff]  }
  0x59   : > { %432 = vmatprep.subr.bf16.mxu0 %v746_v5  ;;  %473 = vmatprep.subr.bf16.mxu1 %v748_v6  ;;  %v756_v11 = vld [vmem:[#allocation5 + $0xa0] ss:$16 sps:$4 sm:$0xff]   ;;  %v757_v12 = vld [vmem:[#allocation5 + $0xa8] ss:$16 sps:$4 sm:$0xff]   ;;  %v758_v13 = vld [vmem:[#allocation5 + $0x84] ss:$16 sps:$4 sm:$0xff]  }
  0x5a   : > { %v760_v14 = vld [vmem:[#allocation5 + $0x8c] ss:$16 sps:$4 sm:$0xff]   ;;  %v762_v15 = vld [vmem:[#allocation5 + $0x80] ss:$16 sps:$4 sm:$0xff]   ;;  %v763_v16 = vld [vmem:[#allocation5 + $0x88] ss:$16 sps:$4 sm:$0xff]  }
  0x5b   : > { %v764_v17 = vld [vmem:[#allocation5 + $0x64] ss:$16 sps:$4 sm:$0xff]   ;;  %v766_v18 = vld [vmem:[#allocation5 + $0x6c] ss:$16 sps:$4 sm:$0xff]   ;;  %v768_v19 = vld [vmem:[#allocation5 + $0x60] ss:$16 sps:$4 sm:$0xff]  }
  0x5c   : > { %433 = vmatpush1.bf16.msra.mxu0 %v750_v7  ;;  %474 = vmatpush1.bf16.msra.mxu1 %v751_v8  ;;  %v769_v20 = vld [vmem:[#allocation5 + $0x68] ss:$16 sps:$4 sm:$0xff]   ;;  %v770_v21 = vld [vmem:[#allocation5 + $0x44] ss:$16 sps:$4 sm:$0xff]   ;;  %v772_v22 = vld [vmem:[#allocation5 + $0x4c] ss:$16 sps:$4 sm:$0xff]  }
  0x5d   : > { %434 = vmatprep.subr.bf16.mxu0 %v752_v9  ;;  %475 = vmatprep.subr.bf16.mxu1 %v754_v10  ;;  %v774_v23 = vld [vmem:[#allocation5 + $0x40] ss:$16 sps:$4 sm:$0xff]   ;;  %v775_v24 = vld [vmem:[#allocation5 + $0x48] ss:$16 sps:$4 sm:$0xff]   ;;  %v776_v25 = vld [vmem:[#allocation5 + $0x24] ss:$16 sps:$4 sm:$0xff]  }
  0x5e   : > { %v778_v26 = vld [vmem:[#allocation5 + $0x2c] ss:$16 sps:$4 sm:$0xff]   ;;  %v780_v27 = vld [vmem:[#allocation5 + $0x20] ss:$16 sps:$4 sm:$0xff]   ;;  %v781_v28 = vld [vmem:[#allocation5 + $0x28] ss:$16 sps:$4 sm:$0xff]  }
  0x5f   : > { %v782_v29 = vld [vmem:[#allocation5 + $0x4] ss:$16 sps:$4 sm:$0xff]   ;;  %v784_v30 = vld [vmem:[#allocation5 + $0xc] ss:$16 sps:$4 sm:$0xff]   ;;  %v786_v31 = vld [vmem:[#allocation5] ss:$16 sps:$4 sm:$0xff]  }
  0x60   : > { %435 = vmatpush1.bf16.msra.mxu0 %v756_v11  ;;  %476 = vmatpush1.bf16.msra.mxu1 %v757_v12  ;;  %v787_v32 = vld [vmem:[#allocation5 + $0x8] ss:$16 sps:$4 sm:$0xff]   ;;  %v251_v36 = vshrl.u32 %v250_v35, 7  ;;  %v248_v39 = vld [vmem:[#allocation7] sm:$0xf]  ;;  %s669_s20 = sshll.u32 %s986_s16, 9 }
  0x61   : > { %436 = vmatprep.subr.bf16.mxu0 %v758_v13  ;;  %477 = vmatprep.subr.bf16.mxu1 %v760_v14  ;;  %v214_v33 = vld [vmem:[%s1086_s4] sm:$0xff]  ;;  %s212_s25 = scalar_lea.vmem [#allocation8], %s631_s18  ;;  %s1102_s5 = scalar_lea.hbm %s1147_s3, %s669_s20 }
  0x62   : > { %v215_v34 = vpack.c.bf16 %v214_v33, %v214_v33  ;;  %v252_v37 = vsub.s32 0, %v251_v36  ;;  %v260_v38 = vsub.s32 2, %v251_v36  ;;  %v256_v40 = vsub.s32 1, %v251_v36  ;;  %s531_s27 = sshll.u32 %s212_s25, 4  ;;  %s517_s16 = scalar_lea.sflag [#allocation4], %s1082_s24  ;;  %s1104_s27 = int_to_ptr.vmem [resolvable:$true] %s531_s27 }
  0x63   : > { %v264_v41 = vsub.s32 3, %v251_v36  ;;  %s868_s6 = scalar_lea.vmem %s1104_s27, 512  ;;  %p1163_p10 = scmp.ne.s32.totalorder %s1157_s10, 0 }
  0x64   : > { %437 = vmatpush1.bf16.msra.mxu0 %v762_v15  ;;  %478 = vmatpush1.bf16.msra.mxu1 %v763_v16  ;;  %v253_v42 = vrot.slane %v248_v39, %v252_v37  ;;  %v261_v43 = vrot.slane %v248_v39, %v260_v38  ;;  %v257_v44 = vrot.slane %v248_v39, %v256_v40  ;;  %p869_p5 = scmp.ne.s32.totalorder %s1104_s27, %s868_s6  ;;  %s944_s8 = smov [#allocation8]  }
  0x65   : > { %438 = vmatprep.subr.bf16.mxu0 %v764_v17  ;;  %479 = vmatprep.subr.bf16.mxu1 %v766_v18  ;;  %v265_v45 = vrot.slane %v248_v39, %v264_v41  ;;  %s872_s9 = sshll.u32 %s944_s8, 4  ;;  %s873_s9 = int_to_ptr.vmem [resolvable:$false] %s872_s9 }
  0x66   : > { %p870_p1 = pnand %p869_p5, %p1163_p10  ;;  %s874_s21 = scalar_lea.vmem %s873_s9, 1024 }
  0x67   : > { %p875_p6 = scmp.lt.s32.totalorder %s1104_s27, %s873_s9  ;;  %p876_p11 = scmp.lt.s32.totalorder %s874_s21, %s868_s6 }
  0x68   : > { %439 = vmatpush1.bf16.msra.mxu0 %v768_v19  ;;  %480 = vmatpush1.bf16.msra.mxu1 %v769_v20  ;;  %p871_p2 = pneg %p870_p1 }
  0x69   : > { %440 = vmatprep.subr.bf16.mxu0 %v770_v21  ;;  %481 = vmatprep.subr.bf16.mxu1 %v772_v22  ;;  %p877_p7 = por %p876_p11, %p875_p6 }
  0x6b   : > { %p878_p9 = pnand %p877_p7, %p871_p2 }
  0x6c   : > { %441 = vmatpush1.bf16.msra.mxu0 %v774_v23  ;;  %482 = vmatpush1.bf16.msra.mxu1 %v775_v24 }
  0x6d   : > { %442 = vmatprep.subr.bf16.mxu0 %v776_v25  ;;  %483 = vmatprep.subr.bf16.mxu1 %v778_v26 }
  0x70   : > { %443 = vmatpush1.bf16.msra.mxu0 %v780_v27  ;;  %484 = vmatpush1.bf16.msra.mxu1 %v781_v28 }
  0x71   : > { %444 = vmatprep.subr.bf16.mxu0 %v782_v29  ;;  %485 = vmatprep.subr.bf16.mxu1 %v784_v30 }
  0x74   : > { %445 = vmatpush1.bf16.msra.mxu0 %v786_v31  ;;  %486 = vmatpush1.bf16.msra.mxu1 %v787_v32 }
  0x77   : > { %463 = vmatmul.mubr.bf16.vlgmr.msra.gmra.mxu0 %v215_v34  ;;  %504 = vmatmul.mubr.bf16.vlgmr.msra.gmra.mxu1 %v215_v34 }
 0x137   : > { %v464_v46 = vpop.f32.mrf.mxu0  ;;  %v505_v47 = vpop.f32.mrf.mxu1 }
 0x138   : > { %v465_v48 = vadd.f32 %v464_v46, %v253_v42  ;;  %v506_v49 = vadd.f32 %v505_v47, %v261_v43 }
 0x139   : > { %v466_v50 = vpop.f32.mrf.mxu0  ;;  %v507_v51 = vpop.f32.mrf.mxu1 }
 0x13a   : > { %512 = vst [vmem:[%s212_s25] sm:$0xff] %v465_v48  ;;  %514 = vst [vmem:[%s212_s25 + $0x10] sm:$0xff] %v506_v49  ;;  %v467_v52 = vadd.f32 %v466_v50, %v257_v44  ;;  %v508_v53 = vadd.f32 %v507_v51, %v265_v45 }
 0x13b   : > { %v468_v54 = vpop.f32.mrf.mxu0  ;;  %v509_v55 = vpop.f32.mrf.mxu1 }
 0x13c   : > { %513 = vst [vmem:[%s212_s25 + $0x8] sm:$0xff] %v467_v52  ;;  %515 = vst [vmem:[%s212_s25 + $0x18] sm:$0xff] %v508_v53 }
 0x13d   : > { %v469_v56 = vpop.f32.mrf.mxu0  ;;  %v510_v57 = vpop.f32.mrf.mxu1 }
 0x13e   : > { %881 = shalt.err (!%p878_p9)
}
 0x13f   : > { %s882_s17 = scalar_lea.hbm %s1102_s5, 512  ;;  %s886_s24 = scalar_lea.hbm %s1147_s3, 2560 }
 0x140   : > { %p883_p12 = scmp.ne.s32.totalorder %s1102_s5, %s882_s17  ;;  %p887_p13 = scmp.lt.s32.totalorder %s1102_s5, %s1147_s3 }
 0x141   : > { %p888_p4 = scmp.lt.s32.totalorder %s886_s24, %s882_s17 }
 0x142   : > { %p884_p3 = pnand %p883_p12, %p1163_p10 }
 0x143   : > { %p889_p8 = por %p888_p4, %p887_p13 }
 0x144   : > { %p885_p0 = pneg %p884_p3 }
 0x146   : > { %p890_p5 = pnand %p889_p8, %p885_p0 }
 0x148   : > { %893 = shalt.err (!%p890_p5)
}
 0x149   : > { %680 = dma.vmem_to_hbm [thread:$0]  (%p1163_p10), %s1104_s27, 512, %s1102_s5, %s517_s16  }
 0x14a PF: > { %p702_p1 = scmp.ge.s32.totalorder %s936_s15, 2  ;;  %s543_s4 = sand.u32 1, %s924_s12  }
 0x14b   : > { %p1164_p2 = scmp.ne.s32.totalorder %s1153_s19, 0  ;;  %s544_s18 = scalar_lea.sflag [#allocation4], %s543_s4 }
 0x14d   : > { %p694_p6 = pnand %p702_p1, %p1164_p2 }
 0x14f   : > { %p695_p11 = pneg %p694_p6 }
 0x151   : > { %919 = dma.done.wait (%p695_p11), %s544_s18, 512  }
 0x152   : > { %921 = vsyncadd (%p695_p11), %s544_s18, 4294966784  ;;  %p17_p7 = scmp.ge.s32.totalorder %s1036_s7, 7   ;;  %s1165_s12 = smov %s928_s13 }
 0x153   : > { %s1166_s13 = smov %s932_s14  ;;  %s1167_s14 = smov %s1052_s11 }
 0x154   : > { %s1168_s15 = smov %s1036_s7  ;;  %19 = sbr.rel (!%p17_p7) target bundleno = 6 (0x6), region = 85 }
 0x159   :  { %549 = vsyncpa [#allocation3], 1 }
 0x15a   :  { %551 = vsyncpa [#allocation3 + $0x1], 1 }
 0x15b   :  { %552 = vsyncpa [#allocation6], 1 }
 0x15c   :  { %553 = vsyncpa [#allocation4], 1 }
 0x15d   :  { %555 = vsyncpa [#allocation4 + $0x1], 1 }

</bundles_post_ra>
